<compile_context>
chip_gen: v5e
topology: v5e:2x2
jax: 0.10.0
libtpu: 0.0.40
codegen_flags: <defaults>
</compile_context>

<pallas_src>
import functools

import jax
import jax.numpy as jnp
import numpy as np
from jax.experimental import pallas as pl
from jax.experimental.pallas import tpu as pltpu

LANES = 128
MAX_BLOCK_ROWS = 1024   # 512 KiB per (rows, 128) f32 buffer
MIN_SPLIT_ROWS = 256    # below 2x this, a single grid step wins (per-step overhead)


def _pick_block_rows(rows):
    """Choose rows-per-block: big blocks, but >=2 grid steps for large inputs."""
    if rows < 2 * MIN_SPLIT_ROWS:
        return rows                                   # one grid step, whole slab
    steps = max(2, -(-rows // MAX_BLOCK_ROWS))        # >=2 so v7x can use both TCs
    block = -(-rows // steps)
    return ((block + 7) // 8) * 8                     # sublane multiple


def _spline_kernel(tab_ref, x_ref, tx_ref, dtx_ref, *, K):
    """Per-tile rational-quadratic spline evaluation.

    tab_ref : SMEM (7, K+1) packed tables:
              row 0: x-knots x_0..x_K (doubles as per-bin x_k)
              row 1: y_k   row 2: dy   row 3: 1/dx   row 4: s_k
              row 5: a = d_{k+1}+d_k-2 s_k            row 6: d_k
    x_ref   : VMEM (block_rows, 128) tile of points.
    tx_ref, dtx_ref : VMEM (block_rows, 128) outputs.
    """
    x = x_ref[...]  # (R, 128) f32

    # torch.searchsorted(x_ks, x, right=False) == #knots strictly < x.
    # K+1 is a small compile-time constant -> unrolled comparison count.
    k = jnp.zeros(x.shape, dtype=jnp.int32)
    for j in range(K + 1):
        k = k + (tab_ref[0, j] < x).astype(jnp.int32)
    # k = where(k==0,1,k)-1, clamped to a valid bin [0, K-1] so out-of-domain
    # points degrade gracefully instead of gathering garbage zeros.
    k = jnp.clip(k, 1, K) - 1

    zeros = jnp.zeros_like(x)
    x_k, y_k, dy = zeros, zeros, zeros
    inv_dx, s, a, d_k = zeros, zeros, zeros, zeros
    # One mask per bin (sel_nk(j) == sel_k(j-1) is folded into the precomputed
    # per-bin tables, so no second compare / nk gather is needed).
    for j in range(K):
        sel = k == j
        x_k    = jnp.where(sel, tab_ref[0, j], x_k)
        y_k    = jnp.where(sel, tab_ref[1, j], y_k)
        dy     = jnp.where(sel, tab_ref[2, j], dy)
        inv_dx = jnp.where(sel, tab_ref[3, j], inv_dx)
        s      = jnp.where(sel, tab_ref[4, j], s)
        a      = jnp.where(sel, tab_ref[5, j], a)
        d_k    = jnp.where(sel, tab_ref[6, j], d_k)

    eps = (x - x_k) * inv_dx            # no per-element divide
    one_m_eps = 1.0 - eps
    e1 = eps * one_m_eps
    eps2 = eps * eps
    two_s = s + s
    d_nk = a + two_s - d_k              # reconstruct instead of gathering a table

    denom = s + a * e1
    inv = 1.0 / denom                   # single exact reciprocal, reused for tx & dtx
    num_tx = s * eps2 + d_k * e1
    num_dtx = d_nk * eps2 + two_s * e1 + d_k * (one_m_eps * one_m_eps)

    tx_ref[...] = y_k + dy * num_tx * inv
    dtx_ref[...] = (s * s) * num_dtx * (inv * inv)


def _build_tables(theta_w, theta_h, theta_d, lb, rt):
    """Tiny K-sized glue: knot construction + per-bin constants, packed for SMEM."""
    dt = theta_w.dtype
    K = theta_w.shape[1]
    width = jax.nn.softmax(theta_w, axis=1) * (rt[0] - lb[0])        # (1, K)
    height = jax.nn.softmax(theta_h, axis=1) * (rt[1] - lb[1])       # (1, K)
    zero = jnp.zeros((1, 1), dt)
    x_ks = jnp.concatenate([zero, jnp.cumsum(width, axis=1)], axis=1) + lb[0]   # (1, K+1)
    y_ks = jnp.concatenate([zero, jnp.cumsum(height, axis=1)], axis=1) + lb[1]  # (1, K+1)
    bval = (rt[1] - lb[1]) / (rt[0] - lb[0])
    bound = jnp.full((1, 1), bval, dt)
    d = jnp.concatenate([bound, jax.nn.softplus(theta_d) + 0.001, bound], axis=1)  # (1, K+1)

    # Per-bin constants (1, K) -> removes per-element divides in the kernel.
    dx = x_ks[:, 1:] - x_ks[:, :-1]
    dy = y_ks[:, 1:] - y_ks[:, :-1]
    inv_dx = 1.0 / dx
    s = dy * inv_dx
    a = d[:, 1:] + d[:, :-1] - 2.0 * s

    pad1 = lambda t: jnp.pad(t, ((0, 0), (0, 1)))   # (1, K) -> (1, K+1)
    tables = jnp.concatenate(
        [x_ks,                     # row 0: knots (and per-bin x_k)
         pad1(y_ks[:, :-1]),       # row 1: y_k
         pad1(dy),                 # row 2: dy
         pad1(inv_dx),             # row 3: 1/dx
         pad1(s),                  # row 4: s_k
         pad1(a),                  # row 5: a
         pad1(d[:, :-1])],         # row 6: d_k
        axis=0)                    # (7, K+1) -> one SMEM operand
    return tables, K


def circular_spline_forward(x, theta_w, theta_h, theta_d,
                            lb=(-1.0, -1.0), rt=(1.0, 1.0)):
    """Pallas forward. x: (N, 1) f32 -> (tx: (N, 1), dtx: (N,))."""
    tables, K = _build_tables(theta_w, theta_h, theta_d, lb, rt)

    N = x.shape[0]
    assert x.shape == (N, 1)
    xs = x.reshape(-1)

    rows = -(-N // LANES)
    block_rows = _pick_block_rows(rows)
    rows_padded = -(-rows // block_rows) * block_rows
    total = rows_padded * LANES
    if total != N:
        # zero-padding lies inside the domain; padded lanes are sliced off below.
        xs = jnp.pad(xs, (0, total - N))
    x2 = xs.reshape(rows_padded, LANES)
    grid = (rows_padded // block_rows,)

    kernel = functools.partial(_spline_kernel, K=K)
    tile_spec = lambda: pl.BlockSpec((block_rows, LANES), lambda i: (i, 0))
    smem_spec = pl.BlockSpec(memory_space=pltpu.MemorySpace.SMEM)

    tx2, dtx2 = pl.pallas_call(
        kernel,
        out_shape=(jax.ShapeDtypeStruct((rows_padded, LANES), x.dtype),
                   jax.ShapeDtypeStruct((rows_padded, LANES), x.dtype)),
        grid_spec=pltpu.PrefetchScalarGridSpec(
            num_scalar_prefetch=0,
            grid=grid,
            in_specs=[smem_spec, tile_spec()],
            out_specs=(tile_spec(), tile_spec()),
        ),
        compiler_params=pltpu.CompilerParams(dimension_semantics=("parallel",)),
    )(tables, x2)

    tx = tx2.reshape(-1)[:N].reshape(N, 1)
    dtx = dtx2.reshape(-1)[:N]
    return tx, dtx


def _reference(x, theta_w, theta_h, theta_d, lb=(-1.0, -1.0), rt=(1.0, 1.0)):
    """Pure-JAX reference mirroring the PyTorch module exactly."""
    dt = theta_w.dtype
    width = jax.nn.softmax(theta_w, axis=1) * (rt[0] - lb[0])
    height = jax.nn.softmax(theta_h, axis=1) * (rt[1] - lb[1])
    zero = jnp.zeros((1, 1), dt)
    x_ks = jnp.concatenate([zero, jnp.cumsum(width, axis=1)], axis=1) + lb[0]
    y_ks = jnp.concatenate([zero, jnp.cumsum(height, axis=1)], axis=1) + lb[1]
    bval = (rt[1] - lb[1]) / (rt[0] - lb[0])
    bound = jnp.full((1, 1), bval, dt)
    derivs = jnp.concatenate([bound, jax.nn.softplus(theta_d) + 0.001, bound], axis=1)

    xs = x[:, 0]
    k = jnp.searchsorted(x_ks[0], xs, side="left")
    k = jnp.where(k == 0, 1, k) - 1
    nk = k + 1
    x_k, x_nk = x_ks[0, k], x_ks[0, nk]
    y_k, y_nk = y_ks[0, k], y_ks[0, nk]
    d_k, d_nk = derivs[0, k], derivs[0, nk]
    s_k = (y_nk - y_k) / (x_nk - x_k)
    eps = (xs - x_k) / (x_nk - x_k)
    denom = s_k + (d_nk + d_k - 2 * s_k) * eps * (1 - eps)
    tx = y_k + (y_nk - y_k) * (s_k * eps**2 + d_k * eps * (1 - eps)) / denom
    dtx = s_k**2 * (d_nk * eps**2 + 2 * s_k * eps * (1 - eps) + d_k * (1 - eps)**2) / denom**2
    return tx[..., None], dtx


if __name__ == "__main__":
    K = 8

    key = jax.random.PRNGKey(0)
    kw, kh, kx, kx2 = jax.random.split(key, 4)

    # Deterministic parameter init matching the module's __init__ shapes:
    #   theta_w: (1, K) ~ randn, theta_h: (1, K) ~ randn,
    #   theta_d: (1, K-1) = softplus_inv(ones) = log(expm1(1)).
    theta_w = jax.random.normal(kw, (1, K), dtype=jnp.float32)
    theta_h = jax.random.normal(kh, (1, K), dtype=jnp.float32)
    theta_d = jnp.full((1, K - 1), float(np.log(np.expm1(1.0))), dtype=jnp.float32)

    # Case 1: lane-aligned N.  Points strictly inside the spline domain (-1, 1).
    N = 2048
    x = jax.random.uniform(kx, (N, 1), dtype=jnp.float32, minval=-0.999, maxval=0.999)
    tx, dtx = circular_spline_forward(x, theta_w, theta_h, theta_d)
    jax.block_until_ready((tx, dtx))
    tx_ref, dtx_ref = _reference(x, theta_w, theta_h, theta_d)
    assert tx.shape == (N, 1) and dtx.shape == (N,)
    np.testing.assert_allclose(np.asarray(tx), np.asarray(tx_ref), rtol=1e-5, atol=1e-5)
    np.testing.assert_allclose(np.asarray(dtx), np.asarray(dtx_ref), rtol=1e-5, atol=1e-5)

    # Case 2: ragged N exercising the padded-tail path.
    N2 = 1000
    x2 = jax.random.uniform(kx2, (N2, 1), dtype=jnp.float32, minval=-0.999, maxval=0.999)
    tx2, dtx2 = circular_spline_forward(x2, theta_w, theta_h, theta_d)
    jax.block_until_ready((tx2, dtx2))
    tx2_ref, dtx2_ref = _reference(x2, theta_w, theta_h, theta_d)
    assert tx2.shape == (N2, 1) and dtx2.shape == (N2,)
    np.testing.assert_allclose(np.asarray(tx2), np.asarray(tx2_ref), rtol=1e-5, atol=1e-5)
    np.testing.assert_allclose(np.asarray(dtx2), np.asarray(dtx2_ref), rtol=1e-5, atol=1e-5)

    print("KERNEL_OK")
</pallas_src>

<mosaic_0001>
module attributes {stable_mosaic.version = 11 : i64} {
  func.func @_spline_kernel(%arg0: i32, %arg1: memref<7x9xf32, #tpu.memory_space<smem>>, %arg2: memref<16x128xf32, #tpu.memory_space<vmem>>, %arg3: memref<16x128xf32, #tpu.memory_space<vmem>>, %arg4: memref<16x128xf32, #tpu.memory_space<vmem>>) attributes {dimension_semantics = [#tpu.dimension_semantics<parallel>], iteration_bounds = array<i64: 1>, scalar_prefetch = 0 : i64, scratch_operands = 0 : i64, tpu.core_type = #tpu.core_type<tc>, window_params = [{transform_indices = @transform_0, window_bounds = array<i64: 7, 9>}, {transform_indices = @transform_1, window_bounds = array<i64: 16, 128>}, {transform_indices = @transform_2, window_bounds = array<i64: 16, 128>}, {transform_indices = @transform_3, window_bounds = array<i64: 16, 128>}]} {
    %c0 = arith.constant 0 : index
    %c0_0 = arith.constant 0 : index
    %0 = vector.load %arg2[%c0, %c0_0] : memref<16x128xf32, #tpu.memory_space<vmem>>, vector<16x128xf32>
    %c0_i32 = arith.constant 0 : i32
    %1 = vector.broadcast %c0_i32 : i32 to vector<16x128xi32>
    %c0_1 = arith.constant 0 : index
    %c0_2 = arith.constant 0 : index
    %2 = memref.load %arg1[%c0_1, %c0_2] : memref<7x9xf32, #tpu.memory_space<smem>>
    %3 = vector.broadcast %2 : f32 to vector<16x128xf32>
    %4 = arith.cmpf olt, %3, %0 : vector<16x128xf32>
    %5 = arith.extui %4 : vector<16x128xi1> to vector<16x128xi32>
    %6 = arith.addi %1, %5 : vector<16x128xi32>
    %c0_3 = arith.constant 0 : index
    %c1 = arith.constant 1 : index
    %7 = memref.load %arg1[%c0_3, %c1] : memref<7x9xf32, #tpu.memory_space<smem>>
    %8 = vector.broadcast %7 : f32 to vector<16x128xf32>
    %9 = arith.cmpf olt, %8, %0 : vector<16x128xf32>
    %10 = arith.extui %9 : vector<16x128xi1> to vector<16x128xi32>
    %11 = arith.addi %6, %10 : vector<16x128xi32>
    %c0_4 = arith.constant 0 : index
    %c2 = arith.constant 2 : index
    %12 = memref.load %arg1[%c0_4, %c2] : memref<7x9xf32, #tpu.memory_space<smem>>
    %13 = vector.broadcast %12 : f32 to vector<16x128xf32>
    %14 = arith.cmpf olt, %13, %0 : vector<16x128xf32>
    %15 = arith.extui %14 : vector<16x128xi1> to vector<16x128xi32>
    %16 = arith.addi %11, %15 : vector<16x128xi32>
    %c0_5 = arith.constant 0 : index
    %c3 = arith.constant 3 : index
    %17 = memref.load %arg1[%c0_5, %c3] : memref<7x9xf32, #tpu.memory_space<smem>>
    %18 = vector.broadcast %17 : f32 to vector<16x128xf32>
    %19 = arith.cmpf olt, %18, %0 : vector<16x128xf32>
    %20 = arith.extui %19 : vector<16x128xi1> to vector<16x128xi32>
    %21 = arith.addi %16, %20 : vector<16x128xi32>
    %c0_6 = arith.constant 0 : index
    %c4 = arith.constant 4 : index
    %22 = memref.load %arg1[%c0_6, %c4] : memref<7x9xf32, #tpu.memory_space<smem>>
    %23 = vector.broadcast %22 : f32 to vector<16x128xf32>
    %24 = arith.cmpf olt, %23, %0 : vector<16x128xf32>
    %25 = arith.extui %24 : vector<16x128xi1> to vector<16x128xi32>
    %26 = arith.addi %21, %25 : vector<16x128xi32>
    %c0_7 = arith.constant 0 : index
    %c5 = arith.constant 5 : index
    %27 = memref.load %arg1[%c0_7, %c5] : memref<7x9xf32, #tpu.memory_space<smem>>
    %28 = vector.broadcast %27 : f32 to vector<16x128xf32>
    %29 = arith.cmpf olt, %28, %0 : vector<16x128xf32>
    %30 = arith.extui %29 : vector<16x128xi1> to vector<16x128xi32>
    %31 = arith.addi %26, %30 : vector<16x128xi32>
    %c0_8 = arith.constant 0 : index
    %c6 = arith.constant 6 : index
    %32 = memref.load %arg1[%c0_8, %c6] : memref<7x9xf32, #tpu.memory_space<smem>>
    %33 = vector.broadcast %32 : f32 to vector<16x128xf32>
    %34 = arith.cmpf olt, %33, %0 : vector<16x128xf32>
    %35 = arith.extui %34 : vector<16x128xi1> to vector<16x128xi32>
    %36 = arith.addi %31, %35 : vector<16x128xi32>
    %c0_9 = arith.constant 0 : index
    %c7 = arith.constant 7 : index
    %37 = memref.load %arg1[%c0_9, %c7] : memref<7x9xf32, #tpu.memory_space<smem>>
    %38 = vector.broadcast %37 : f32 to vector<16x128xf32>
    %39 = arith.cmpf olt, %38, %0 : vector<16x128xf32>
    %40 = arith.extui %39 : vector<16x128xi1> to vector<16x128xi32>
    %41 = arith.addi %36, %40 : vector<16x128xi32>
    %c0_10 = arith.constant 0 : index
    %c8 = arith.constant 8 : index
    %42 = memref.load %arg1[%c0_10, %c8] : memref<7x9xf32, #tpu.memory_space<smem>>
    %43 = vector.broadcast %42 : f32 to vector<16x128xf32>
    %44 = arith.cmpf olt, %43, %0 : vector<16x128xf32>
    %45 = arith.extui %44 : vector<16x128xi1> to vector<16x128xi32>
    %46 = arith.addi %41, %45 : vector<16x128xi32>
    %c1_i32 = arith.constant 1 : i32
    %c8_i32 = arith.constant 8 : i32
    %47 = vector.broadcast %c1_i32 : i32 to vector<16x128xi32>
    %48 = arith.maxsi %47, %46 : vector<16x128xi32>
    %49 = vector.broadcast %c8_i32 : i32 to vector<16x128xi32>
    %50 = arith.minsi %49, %48 : vector<16x128xi32>
    %c1_i32_11 = arith.constant 1 : i32
    %51 = vector.broadcast %c1_i32_11 : i32 to vector<16x128xi32>
    %52 = arith.subi %50, %51 : vector<16x128xi32>
    %cst = arith.constant 0.000000e+00 : f32
    %53 = vector.broadcast %cst : f32 to vector<16x128xf32>
    %c0_i32_12 = arith.constant 0 : i32
    %54 = vector.broadcast %c0_i32_12 : i32 to vector<16x128xi32>
    %55 = arith.cmpi eq, %52, %54 : vector<16x128xi32>
    %c0_13 = arith.constant 0 : index
    %c0_14 = arith.constant 0 : index
    %56 = memref.load %arg1[%c0_13, %c0_14] : memref<7x9xf32, #tpu.memory_space<smem>>
    %57 = vector.broadcast %56 : f32 to vector<16x128xf32>
    %58 = arith.select %55, %57, %53 : vector<16x128xi1>, vector<16x128xf32>
    %c1_15 = arith.constant 1 : index
    %c0_16 = arith.constant 0 : index
    %59 = memref.load %arg1[%c1_15, %c0_16] : memref<7x9xf32, #tpu.memory_space<smem>>
    %60 = vector.broadcast %59 : f32 to vector<16x128xf32>
    %61 = arith.select %55, %60, %53 : vector<16x128xi1>, vector<16x128xf32>
    %c2_17 = arith.constant 2 : index
    %c0_18 = arith.constant 0 : index
    %62 = memref.load %arg1[%c2_17, %c0_18] : memref<7x9xf32, #tpu.memory_space<smem>>
    %63 = vector.broadcast %62 : f32 to vector<16x128xf32>
    %64 = arith.select %55, %63, %53 : vector<16x128xi1>, vector<16x128xf32>
    %c3_19 = arith.constant 3 : index
    %c0_20 = arith.constant 0 : index
    %65 = memref.load %arg1[%c3_19, %c0_20] : memref<7x9xf32, #tpu.memory_space<smem>>
    %66 = vector.broadcast %65 : f32 to vector<16x128xf32>
    %67 = arith.select %55, %66, %53 : vector<16x128xi1>, vector<16x128xf32>
    %c4_21 = arith.constant 4 : index
    %c0_22 = arith.constant 0 : index
    %68 = memref.load %arg1[%c4_21, %c0_22] : memref<7x9xf32, #tpu.memory_space<smem>>
    %69 = vector.broadcast %68 : f32 to vector<16x128xf32>
    %70 = arith.select %55, %69, %53 : vector<16x128xi1>, vector<16x128xf32>
    %c5_23 = arith.constant 5 : index
    %c0_24 = arith.constant 0 : index
    %71 = memref.load %arg1[%c5_23, %c0_24] : memref<7x9xf32, #tpu.memory_space<smem>>
    %72 = vector.broadcast %71 : f32 to vector<16x128xf32>
    %73 = arith.select %55, %72, %53 : vector<16x128xi1>, vector<16x128xf32>
    %c6_25 = arith.constant 6 : index
    %c0_26 = arith.constant 0 : index
    %74 = memref.load %arg1[%c6_25, %c0_26] : memref<7x9xf32, #tpu.memory_space<smem>>
    %75 = vector.broadcast %74 : f32 to vector<16x128xf32>
    %76 = arith.select %55, %75, %53 : vector<16x128xi1>, vector<16x128xf32>
    %c1_i32_27 = arith.constant 1 : i32
    %77 = vector.broadcast %c1_i32_27 : i32 to vector<16x128xi32>
    %78 = arith.cmpi eq, %52, %77 : vector<16x128xi32>
    %c0_28 = arith.constant 0 : index
    %c1_29 = arith.constant 1 : index
    %79 = memref.load %arg1[%c0_28, %c1_29] : memref<7x9xf32, #tpu.memory_space<smem>>
    %80 = vector.broadcast %79 : f32 to vector<16x128xf32>
    %81 = arith.select %78, %80, %58 : vector<16x128xi1>, vector<16x128xf32>
    %c1_30 = arith.constant 1 : index
    %c1_31 = arith.constant 1 : index
    %82 = memref.load %arg1[%c1_30, %c1_31] : memref<7x9xf32, #tpu.memory_space<smem>>
    %83 = vector.broadcast %82 : f32 to vector<16x128xf32>
    %84 = arith.select %78, %83, %61 : vector<16x128xi1>, vector<16x128xf32>
    %c2_32 = arith.constant 2 : index
    %c1_33 = arith.constant 1 : index
    %85 = memref.load %arg1[%c2_32, %c1_33] : memref<7x9xf32, #tpu.memory_space<smem>>
    %86 = vector.broadcast %85 : f32 to vector<16x128xf32>
    %87 = arith.select %78, %86, %64 : vector<16x128xi1>, vector<16x128xf32>
    %c3_34 = arith.constant 3 : index
    %c1_35 = arith.constant 1 : index
    %88 = memref.load %arg1[%c3_34, %c1_35] : memref<7x9xf32, #tpu.memory_space<smem>>
    %89 = vector.broadcast %88 : f32 to vector<16x128xf32>
    %90 = arith.select %78, %89, %67 : vector<16x128xi1>, vector<16x128xf32>
    %c4_36 = arith.constant 4 : index
    %c1_37 = arith.constant 1 : index
    %91 = memref.load %arg1[%c4_36, %c1_37] : memref<7x9xf32, #tpu.memory_space<smem>>
    %92 = vector.broadcast %91 : f32 to vector<16x128xf32>
    %93 = arith.select %78, %92, %70 : vector<16x128xi1>, vector<16x128xf32>
    %c5_38 = arith.constant 5 : index
    %c1_39 = arith.constant 1 : index
    %94 = memref.load %arg1[%c5_38, %c1_39] : memref<7x9xf32, #tpu.memory_space<smem>>
    %95 = vector.broadcast %94 : f32 to vector<16x128xf32>
    %96 = arith.select %78, %95, %73 : vector<16x128xi1>, vector<16x128xf32>
    %c6_40 = arith.constant 6 : index
    %c1_41 = arith.constant 1 : index
    %97 = memref.load %arg1[%c6_40, %c1_41] : memref<7x9xf32, #tpu.memory_space<smem>>
    %98 = vector.broadcast %97 : f32 to vector<16x128xf32>
    %99 = arith.select %78, %98, %76 : vector<16x128xi1>, vector<16x128xf32>
    %c2_i32 = arith.constant 2 : i32
    %100 = vector.broadcast %c2_i32 : i32 to vector<16x128xi32>
    %101 = arith.cmpi eq, %52, %100 : vector<16x128xi32>
    %c0_42 = arith.constant 0 : index
    %c2_43 = arith.constant 2 : index
    %102 = memref.load %arg1[%c0_42, %c2_43] : memref<7x9xf32, #tpu.memory_space<smem>>
    %103 = vector.broadcast %102 : f32 to vector<16x128xf32>
    %104 = arith.select %101, %103, %81 : vector<16x128xi1>, vector<16x128xf32>
    %c1_44 = arith.constant 1 : index
    %c2_45 = arith.constant 2 : index
    %105 = memref.load %arg1[%c1_44, %c2_45] : memref<7x9xf32, #tpu.memory_space<smem>>
    %106 = vector.broadcast %105 : f32 to vector<16x128xf32>
    %107 = arith.select %101, %106, %84 : vector<16x128xi1>, vector<16x128xf32>
    %c2_46 = arith.constant 2 : index
    %c2_47 = arith.constant 2 : index
    %108 = memref.load %arg1[%c2_46, %c2_47] : memref<7x9xf32, #tpu.memory_space<smem>>
    %109 = vector.broadcast %108 : f32 to vector<16x128xf32>
    %110 = arith.select %101, %109, %87 : vector<16x128xi1>, vector<16x128xf32>
    %c3_48 = arith.constant 3 : index
    %c2_49 = arith.constant 2 : index
    %111 = memref.load %arg1[%c3_48, %c2_49] : memref<7x9xf32, #tpu.memory_space<smem>>
    %112 = vector.broadcast %111 : f32 to vector<16x128xf32>
    %113 = arith.select %101, %112, %90 : vector<16x128xi1>, vector<16x128xf32>
    %c4_50 = arith.constant 4 : index
    %c2_51 = arith.constant 2 : index
    %114 = memref.load %arg1[%c4_50, %c2_51] : memref<7x9xf32, #tpu.memory_space<smem>>
    %115 = vector.broadcast %114 : f32 to vector<16x128xf32>
    %116 = arith.select %101, %115, %93 : vector<16x128xi1>, vector<16x128xf32>
    %c5_52 = arith.constant 5 : index
    %c2_53 = arith.constant 2 : index
    %117 = memref.load %arg1[%c5_52, %c2_53] : memref<7x9xf32, #tpu.memory_space<smem>>
    %118 = vector.broadcast %117 : f32 to vector<16x128xf32>
    %119 = arith.select %101, %118, %96 : vector<16x128xi1>, vector<16x128xf32>
    %c6_54 = arith.constant 6 : index
    %c2_55 = arith.constant 2 : index
    %120 = memref.load %arg1[%c6_54, %c2_55] : memref<7x9xf32, #tpu.memory_space<smem>>
    %121 = vector.broadcast %120 : f32 to vector<16x128xf32>
    %122 = arith.select %101, %121, %99 : vector<16x128xi1>, vector<16x128xf32>
    %c3_i32 = arith.constant 3 : i32
    %123 = vector.broadcast %c3_i32 : i32 to vector<16x128xi32>
    %124 = arith.cmpi eq, %52, %123 : vector<16x128xi32>
    %c0_56 = arith.constant 0 : index
    %c3_57 = arith.constant 3 : index
    %125 = memref.load %arg1[%c0_56, %c3_57] : memref<7x9xf32, #tpu.memory_space<smem>>
    %126 = vector.broadcast %125 : f32 to vector<16x128xf32>
    %127 = arith.select %124, %126, %104 : vector<16x128xi1>, vector<16x128xf32>
    %c1_58 = arith.constant 1 : index
    %c3_59 = arith.constant 3 : index
    %128 = memref.load %arg1[%c1_58, %c3_59] : memref<7x9xf32, #tpu.memory_space<smem>>
    %129 = vector.broadcast %128 : f32 to vector<16x128xf32>
    %130 = arith.select %124, %129, %107 : vector<16x128xi1>, vector<16x128xf32>
    %c2_60 = arith.constant 2 : index
    %c3_61 = arith.constant 3 : index
    %131 = memref.load %arg1[%c2_60, %c3_61] : memref<7x9xf32, #tpu.memory_space<smem>>
    %132 = vector.broadcast %131 : f32 to vector<16x128xf32>
    %133 = arith.select %124, %132, %110 : vector<16x128xi1>, vector<16x128xf32>
    %c3_62 = arith.constant 3 : index
    %c3_63 = arith.constant 3 : index
    %134 = memref.load %arg1[%c3_62, %c3_63] : memref<7x9xf32, #tpu.memory_space<smem>>
    %135 = vector.broadcast %134 : f32 to vector<16x128xf32>
    %136 = arith.select %124, %135, %113 : vector<16x128xi1>, vector<16x128xf32>
    %c4_64 = arith.constant 4 : index
    %c3_65 = arith.constant 3 : index
    %137 = memref.load %arg1[%c4_64, %c3_65] : memref<7x9xf32, #tpu.memory_space<smem>>
    %138 = vector.broadcast %137 : f32 to vector<16x128xf32>
    %139 = arith.select %124, %138, %116 : vector<16x128xi1>, vector<16x128xf32>
    %c5_66 = arith.constant 5 : index
    %c3_67 = arith.constant 3 : index
    %140 = memref.load %arg1[%c5_66, %c3_67] : memref<7x9xf32, #tpu.memory_space<smem>>
    %141 = vector.broadcast %140 : f32 to vector<16x128xf32>
    %142 = arith.select %124, %141, %119 : vector<16x128xi1>, vector<16x128xf32>
    %c6_68 = arith.constant 6 : index
    %c3_69 = arith.constant 3 : index
    %143 = memref.load %arg1[%c6_68, %c3_69] : memref<7x9xf32, #tpu.memory_space<smem>>
    %144 = vector.broadcast %143 : f32 to vector<16x128xf32>
    %145 = arith.select %124, %144, %122 : vector<16x128xi1>, vector<16x128xf32>
    %c4_i32 = arith.constant 4 : i32
    %146 = vector.broadcast %c4_i32 : i32 to vector<16x128xi32>
    %147 = arith.cmpi eq, %52, %146 : vector<16x128xi32>
    %c0_70 = arith.constant 0 : index
    %c4_71 = arith.constant 4 : index
    %148 = memref.load %arg1[%c0_70, %c4_71] : memref<7x9xf32, #tpu.memory_space<smem>>
    %149 = vector.broadcast %148 : f32 to vector<16x128xf32>
    %150 = arith.select %147, %149, %127 : vector<16x128xi1>, vector<16x128xf32>
    %c1_72 = arith.constant 1 : index
    %c4_73 = arith.constant 4 : index
    %151 = memref.load %arg1[%c1_72, %c4_73] : memref<7x9xf32, #tpu.memory_space<smem>>
    %152 = vector.broadcast %151 : f32 to vector<16x128xf32>
    %153 = arith.select %147, %152, %130 : vector<16x128xi1>, vector<16x128xf32>
    %c2_74 = arith.constant 2 : index
    %c4_75 = arith.constant 4 : index
    %154 = memref.load %arg1[%c2_74, %c4_75] : memref<7x9xf32, #tpu.memory_space<smem>>
    %155 = vector.broadcast %154 : f32 to vector<16x128xf32>
    %156 = arith.select %147, %155, %133 : vector<16x128xi1>, vector<16x128xf32>
    %c3_76 = arith.constant 3 : index
    %c4_77 = arith.constant 4 : index
    %157 = memref.load %arg1[%c3_76, %c4_77] : memref<7x9xf32, #tpu.memory_space<smem>>
    %158 = vector.broadcast %157 : f32 to vector<16x128xf32>
    %159 = arith.select %147, %158, %136 : vector<16x128xi1>, vector<16x128xf32>
    %c4_78 = arith.constant 4 : index
    %c4_79 = arith.constant 4 : index
    %160 = memref.load %arg1[%c4_78, %c4_79] : memref<7x9xf32, #tpu.memory_space<smem>>
    %161 = vector.broadcast %160 : f32 to vector<16x128xf32>
    %162 = arith.select %147, %161, %139 : vector<16x128xi1>, vector<16x128xf32>
    %c5_80 = arith.constant 5 : index
    %c4_81 = arith.constant 4 : index
    %163 = memref.load %arg1[%c5_80, %c4_81] : memref<7x9xf32, #tpu.memory_space<smem>>
    %164 = vector.broadcast %163 : f32 to vector<16x128xf32>
    %165 = arith.select %147, %164, %142 : vector<16x128xi1>, vector<16x128xf32>
    %c6_82 = arith.constant 6 : index
    %c4_83 = arith.constant 4 : index
    %166 = memref.load %arg1[%c6_82, %c4_83] : memref<7x9xf32, #tpu.memory_space<smem>>
    %167 = vector.broadcast %166 : f32 to vector<16x128xf32>
    %168 = arith.select %147, %167, %145 : vector<16x128xi1>, vector<16x128xf32>
    %c5_i32 = arith.constant 5 : i32
    %169 = vector.broadcast %c5_i32 : i32 to vector<16x128xi32>
    %170 = arith.cmpi eq, %52, %169 : vector<16x128xi32>
    %c0_84 = arith.constant 0 : index
    %c5_85 = arith.constant 5 : index
    %171 = memref.load %arg1[%c0_84, %c5_85] : memref<7x9xf32, #tpu.memory_space<smem>>
    %172 = vector.broadcast %171 : f32 to vector<16x128xf32>
    %173 = arith.select %170, %172, %150 : vector<16x128xi1>, vector<16x128xf32>
    %c1_86 = arith.constant 1 : index
    %c5_87 = arith.constant 5 : index
    %174 = memref.load %arg1[%c1_86, %c5_87] : memref<7x9xf32, #tpu.memory_space<smem>>
    %175 = vector.broadcast %174 : f32 to vector<16x128xf32>
    %176 = arith.select %170, %175, %153 : vector<16x128xi1>, vector<16x128xf32>
    %c2_88 = arith.constant 2 : index
    %c5_89 = arith.constant 5 : index
    %177 = memref.load %arg1[%c2_88, %c5_89] : memref<7x9xf32, #tpu.memory_space<smem>>
    %178 = vector.broadcast %177 : f32 to vector<16x128xf32>
    %179 = arith.select %170, %178, %156 : vector<16x128xi1>, vector<16x128xf32>
    %c3_90 = arith.constant 3 : index
    %c5_91 = arith.constant 5 : index
    %180 = memref.load %arg1[%c3_90, %c5_91] : memref<7x9xf32, #tpu.memory_space<smem>>
    %181 = vector.broadcast %180 : f32 to vector<16x128xf32>
    %182 = arith.select %170, %181, %159 : vector<16x128xi1>, vector<16x128xf32>
    %c4_92 = arith.constant 4 : index
    %c5_93 = arith.constant 5 : index
    %183 = memref.load %arg1[%c4_92, %c5_93] : memref<7x9xf32, #tpu.memory_space<smem>>
    %184 = vector.broadcast %183 : f32 to vector<16x128xf32>
    %185 = arith.select %170, %184, %162 : vector<16x128xi1>, vector<16x128xf32>
    %c5_94 = arith.constant 5 : index
    %c5_95 = arith.constant 5 : index
    %186 = memref.load %arg1[%c5_94, %c5_95] : memref<7x9xf32, #tpu.memory_space<smem>>
    %187 = vector.broadcast %186 : f32 to vector<16x128xf32>
    %188 = arith.select %170, %187, %165 : vector<16x128xi1>, vector<16x128xf32>
    %c6_96 = arith.constant 6 : index
    %c5_97 = arith.constant 5 : index
    %189 = memref.load %arg1[%c6_96, %c5_97] : memref<7x9xf32, #tpu.memory_space<smem>>
    %190 = vector.broadcast %189 : f32 to vector<16x128xf32>
    %191 = arith.select %170, %190, %168 : vector<16x128xi1>, vector<16x128xf32>
    %c6_i32 = arith.constant 6 : i32
    %192 = vector.broadcast %c6_i32 : i32 to vector<16x128xi32>
    %193 = arith.cmpi eq, %52, %192 : vector<16x128xi32>
    %c0_98 = arith.constant 0 : index
    %c6_99 = arith.constant 6 : index
    %194 = memref.load %arg1[%c0_98, %c6_99] : memref<7x9xf32, #tpu.memory_space<smem>>
    %195 = vector.broadcast %194 : f32 to vector<16x128xf32>
    %196 = arith.select %193, %195, %173 : vector<16x128xi1>, vector<16x128xf32>
    %c1_100 = arith.constant 1 : index
    %c6_101 = arith.constant 6 : index
    %197 = memref.load %arg1[%c1_100, %c6_101] : memref<7x9xf32, #tpu.memory_space<smem>>
    %198 = vector.broadcast %197 : f32 to vector<16x128xf32>
    %199 = arith.select %193, %198, %176 : vector<16x128xi1>, vector<16x128xf32>
    %c2_102 = arith.constant 2 : index
    %c6_103 = arith.constant 6 : index
    %200 = memref.load %arg1[%c2_102, %c6_103] : memref<7x9xf32, #tpu.memory_space<smem>>
    %201 = vector.broadcast %200 : f32 to vector<16x128xf32>
    %202 = arith.select %193, %201, %179 : vector<16x128xi1>, vector<16x128xf32>
    %c3_104 = arith.constant 3 : index
    %c6_105 = arith.constant 6 : index
    %203 = memref.load %arg1[%c3_104, %c6_105] : memref<7x9xf32, #tpu.memory_space<smem>>
    %204 = vector.broadcast %203 : f32 to vector<16x128xf32>
    %205 = arith.select %193, %204, %182 : vector<16x128xi1>, vector<16x128xf32>
    %c4_106 = arith.constant 4 : index
    %c6_107 = arith.constant 6 : index
    %206 = memref.load %arg1[%c4_106, %c6_107] : memref<7x9xf32, #tpu.memory_space<smem>>
    %207 = vector.broadcast %206 : f32 to vector<16x128xf32>
    %208 = arith.select %193, %207, %185 : vector<16x128xi1>, vector<16x128xf32>
    %c5_108 = arith.constant 5 : index
    %c6_109 = arith.constant 6 : index
    %209 = memref.load %arg1[%c5_108, %c6_109] : memref<7x9xf32, #tpu.memory_space<smem>>
    %210 = vector.broadcast %209 : f32 to vector<16x128xf32>
    %211 = arith.select %193, %210, %188 : vector<16x128xi1>, vector<16x128xf32>
    %c6_110 = arith.constant 6 : index
    %c6_111 = arith.constant 6 : index
    %212 = memref.load %arg1[%c6_110, %c6_111] : memref<7x9xf32, #tpu.memory_space<smem>>
    %213 = vector.broadcast %212 : f32 to vector<16x128xf32>
    %214 = arith.select %193, %213, %191 : vector<16x128xi1>, vector<16x128xf32>
    %c7_i32 = arith.constant 7 : i32
    %215 = vector.broadcast %c7_i32 : i32 to vector<16x128xi32>
    %216 = arith.cmpi eq, %52, %215 : vector<16x128xi32>
    %c0_112 = arith.constant 0 : index
    %c7_113 = arith.constant 7 : index
    %217 = memref.load %arg1[%c0_112, %c7_113] : memref<7x9xf32, #tpu.memory_space<smem>>
    %218 = vector.broadcast %217 : f32 to vector<16x128xf32>
    %219 = arith.select %216, %218, %196 : vector<16x128xi1>, vector<16x128xf32>
    %c1_114 = arith.constant 1 : index
    %c7_115 = arith.constant 7 : index
    %220 = memref.load %arg1[%c1_114, %c7_115] : memref<7x9xf32, #tpu.memory_space<smem>>
    %221 = vector.broadcast %220 : f32 to vector<16x128xf32>
    %222 = arith.select %216, %221, %199 : vector<16x128xi1>, vector<16x128xf32>
    %c2_116 = arith.constant 2 : index
    %c7_117 = arith.constant 7 : index
    %223 = memref.load %arg1[%c2_116, %c7_117] : memref<7x9xf32, #tpu.memory_space<smem>>
    %224 = vector.broadcast %223 : f32 to vector<16x128xf32>
    %225 = arith.select %216, %224, %202 : vector<16x128xi1>, vector<16x128xf32>
    %c3_118 = arith.constant 3 : index
    %c7_119 = arith.constant 7 : index
    %226 = memref.load %arg1[%c3_118, %c7_119] : memref<7x9xf32, #tpu.memory_space<smem>>
    %227 = vector.broadcast %226 : f32 to vector<16x128xf32>
    %228 = arith.select %216, %227, %205 : vector<16x128xi1>, vector<16x128xf32>
    %c4_120 = arith.constant 4 : index
    %c7_121 = arith.constant 7 : index
    %229 = memref.load %arg1[%c4_120, %c7_121] : memref<7x9xf32, #tpu.memory_space<smem>>
    %230 = vector.broadcast %229 : f32 to vector<16x128xf32>
    %231 = arith.select %216, %230, %208 : vector<16x128xi1>, vector<16x128xf32>
    %c5_122 = arith.constant 5 : index
    %c7_123 = arith.constant 7 : index
    %232 = memref.load %arg1[%c5_122, %c7_123] : memref<7x9xf32, #tpu.memory_space<smem>>
    %233 = vector.broadcast %232 : f32 to vector<16x128xf32>
    %234 = arith.select %216, %233, %211 : vector<16x128xi1>, vector<16x128xf32>
    %c6_124 = arith.constant 6 : index
    %c7_125 = arith.constant 7 : index
    %235 = memref.load %arg1[%c6_124, %c7_125] : memref<7x9xf32, #tpu.memory_space<smem>>
    %236 = vector.broadcast %235 : f32 to vector<16x128xf32>
    %237 = arith.select %216, %236, %214 : vector<16x128xi1>, vector<16x128xf32>
    %238 = arith.subf %0, %219 : vector<16x128xf32>
    %239 = arith.mulf %238, %228 : vector<16x128xf32>
    %cst_126 = arith.constant 1.000000e+00 : f32
    %240 = vector.broadcast %cst_126 : f32 to vector<16x128xf32>
    %241 = arith.subf %240, %239 : vector<16x128xf32>
    %242 = arith.mulf %239, %241 : vector<16x128xf32>
    %243 = arith.mulf %239, %239 : vector<16x128xf32>
    %244 = arith.addf %231, %231 : vector<16x128xf32>
    %245 = arith.addf %234, %244 : vector<16x128xf32>
    %246 = arith.subf %245, %237 : vector<16x128xf32>
    %247 = arith.mulf %234, %242 : vector<16x128xf32>
    %248 = arith.addf %231, %247 : vector<16x128xf32>
    %cst_127 = arith.constant 1.000000e+00 : f32
    %249 = vector.broadcast %cst_127 : f32 to vector<16x128xf32>
    %250 = arith.divf %249, %248 : vector<16x128xf32>
    %251 = arith.mulf %231, %243 : vector<16x128xf32>
    %252 = arith.mulf %237, %242 : vector<16x128xf32>
    %253 = arith.addf %251, %252 : vector<16x128xf32>
    %254 = arith.mulf %246, %243 : vector<16x128xf32>
    %255 = arith.mulf %244, %242 : vector<16x128xf32>
    %256 = arith.addf %254, %255 : vector<16x128xf32>
    %257 = arith.mulf %241, %241 : vector<16x128xf32>
    %258 = arith.mulf %237, %257 : vector<16x128xf32>
    %259 = arith.addf %256, %258 : vector<16x128xf32>
    %260 = arith.mulf %225, %253 : vector<16x128xf32>
    %261 = arith.mulf %260, %250 : vector<16x128xf32>
    %262 = arith.addf %222, %261 : vector<16x128xf32>
    %c0_128 = arith.constant 0 : index
    %c0_129 = arith.constant 0 : index
    %263 = vector.load %arg3[%c0_128, %c0_129] : memref<16x128xf32, #tpu.memory_space<vmem>>, vector<16x128xf32>
    tpu.vector_store %arg3[%c0_128, %c0_129], %262 {strides = array<i32>} : memref<16x128xf32, #tpu.memory_space<vmem>>, vector<16x128xf32>,
    %264 = arith.mulf %231, %231 : vector<16x128xf32>
    %265 = arith.mulf %264, %259 : vector<16x128xf32>
    %266 = arith.mulf %250, %250 : vector<16x128xf32>
    %267 = arith.mulf %265, %266 : vector<16x128xf32>
    %c0_130 = arith.constant 0 : index
    %c0_131 = arith.constant 0 : index
    %268 = vector.load %arg4[%c0_130, %c0_131] : memref<16x128xf32, #tpu.memory_space<vmem>>, vector<16x128xf32>
    tpu.vector_store %arg4[%c0_130, %c0_131], %267 {strides = array<i32>} : memref<16x128xf32, #tpu.memory_space<vmem>>, vector<16x128xf32>,
    return
  }
  func.func @transform_0(%arg0: i32) -> (i32, i32) {
    %c0_i32 = arith.constant 0 : i32
    %c0_i32_0 = arith.constant 0 : i32
    %c0_i32_1 = arith.constant 0 : i32
    return %c0_i32, %c0_i32_0 : i32, i32
  }
  func.func @transform_1(%arg0: i32) -> (i32, i32) {
    %c0_i32 = arith.constant 0 : i32
    %c0_i32_0 = arith.constant 0 : i32
    return %arg0, %c0_i32 : i32, i32
  }
  func.func @transform_2(%arg0: i32) -> (i32, i32) {
    %c0_i32 = arith.constant 0 : i32
    %c0_i32_0 = arith.constant 0 : i32
    return %arg0, %c0_i32 : i32, i32
  }
  func.func @transform_3(%arg0: i32) -> (i32, i32) {
    %c0_i32 = arith.constant 0 : i32
    %c0_i32_0 = arith.constant 0 : i32
    return %arg0, %c0_i32 : i32, i32
  }
}

</mosaic_0001>

<bundles_post_ra>
// kernel: tpu_custom_call.1
= control target key start
LH: loop header
LB: loop body
LE: loop exit
PB: predicated region body
PF: predicated region fallthrough
CT: control target
= control target key end

     0   :  { %9 = vsyncpa [#allocation5], 0  ;;  %s1189_s0 = inlined_call_operand.hbm [shape: f32[7,9], index: 0, kind: input, shape index: {}]   ;;  %s1190_s1 = inlined_call_operand.hbm [shape: f32[16,128], index: 1, kind: input, shape index: {}]   ;;  %s1191_s2 = inlined_call_operand.hbm [shape: f32[16,128], index: 2, kind: output, shape index: {0}]   ;;  %s1192_s3 = inlined_call_operand.hbm [shape: f32[16,128], index: 3, kind: output, shape index: {1}]  }
   0x1   :  { %10 = vsyncpa [#allocation3], 0 }
   0x2   :  { %11 = vsyncpa [#allocation4], 0 }
   0x3   :  { %12 = vsyncpa [#allocation9], 0  ;;  %s18_s14 = sshll.u32 %s1189_s0, 4  ;;  %s26_s17 = sshll.u32 %s1190_s1, 4  ;;  %s19_s14 = int_to_ptr.hbm [resolvable:$true] %s18_s14  ;;  %s27_s17 = int_to_ptr.hbm [resolvable:$true] %s26_s17 }
   0x4   :  { %s635_s18 = smov [#allocation2]   ;;  %s636_s19 = smov [#allocation6]  }
   0x5   :  { %21 = dma.hbm_to_smem %s19_s14, 128, %s635_s18, [#allocation5]  }
   0x6   :  { %s28_s20 = sshll.u32 %s636_s19, 4  ;;  %s637_s21 = smov 128   ;;  %s29_s20 = int_to_ptr.vmem [resolvable:$true] %s28_s20 }
   0x7   :  { %s638_s22 = smov 8  }
   0x8   :  { %34 = dma.hbm_to_vmem [thread:$0]  %s27_s17, 256, %s29_s20, [#allocation3], %s637_s21, %s637_s21, %s638_s22  }
   0x9   :  { %627 = dma.done.wait [#allocation5], 128  }
   0xa   :  { %628 = vsyncadd [#allocation5], 4294967168 }
   0xb   :  { %629 = dma.done.wait [#allocation3], 256  }
   0xc   :  { %630 = vsyncadd [#allocation3], 4294967040 }
   0xd   :  { %43 = sfence }
   0xe   :  { %s46_s0 = sld [smem:[#allocation2]]  ;;  %v671_v0 = vld [vmem:[#allocation6] sm:$0xff]  ;;  %v673_v1 = vld [vmem:[#allocation6 + $0x8] sm:$0xff]  ;;  %v639_v4 = vmov 0  }
   0xf   :  { %s474_s23 = sld [smem:[#allocation2 + $0x1]] }
  0x10   :  { %s475_s1 = sld [smem:[#allocation2 + $0x2]] }
  0x11   :  { %s476_s24 = sld [smem:[#allocation2 + $0x3]] }
  0x12   :  { %s477_s25 = sld [smem:[#allocation2 + $0x4]] }
  0x13   :  { %s478_s26 = sld [smem:[#allocation2 + $0x5]] }
  0x14   :  { %v675_v2 = vstv %s46_s0  ;;  %s479_s27 = sld [smem:[#allocation2 + $0x6]] }
  0x15   :  { %vm48_vm0 = vcmp.lt.f32.partialorder %v675_v2, %v671_v0  ;;  %vm49_vm1 = vcmp.lt.f32.partialorder %v675_v2, %v673_v1  ;;  %v681_v3 = vstv %s474_s23  ;;  %s480_s28 = sld [smem:[#allocation2 + $0x7]] }
  0x16   :  { %v50_v5 = vsel %vm48_vm0, 1, %v639_v4  ;;  %v51_v6 = vsel %vm49_vm1, 1, %v639_v4  ;;  %vm54_vm2 = vcmp.lt.f32.partialorder %v681_v3, %v671_v0  ;;  %vm55_vm3 = vcmp.lt.f32.partialorder %v681_v3, %v673_v1  ;;  %s699_s29 = sld [smem:[#allocation2 + $0x8]] }
  0x17   :  { %v56_v7 = vsel %vm54_vm2, 1, %v639_v4  ;;  %v57_v8 = vsel %vm55_vm3, 1, %v639_v4  ;;  %v687_v9 = vstv %s475_s1  ;;  %v689_v10 = vstv %s476_s24  ;;  %s725_s30 = sld [smem:[#allocation2 + $0x80]] }
  0x18   :  { %v58_v11 = vadd.s32 %v56_v7, %v50_v5  ;;  %v59_v12 = vadd.s32 %v57_v8, %v51_v6  ;;  %vm62_vm4 = vcmp.lt.f32.partialorder %v687_v9, %v671_v0  ;;  %vm63_vm5 = vcmp.lt.f32.partialorder %v687_v9, %v673_v1  ;;  %s727_s4 = sld [smem:[#allocation2 + $0x100]] }
  0x19   :  { %v64_v13 = vsel %vm62_vm4, 1, %v639_v4  ;;  %v65_v14 = vsel %vm63_vm5, 1, %v639_v4  ;;  %vm70_vm6 = vcmp.lt.f32.partialorder %v689_v10, %v671_v0  ;;  %vm71_vm7 = vcmp.lt.f32.partialorder %v689_v10, %v673_v1  ;;  %s730_s5 = sld [smem:[#allocation2 + $0x180]] }
  0x1a   :  { %v66_v15 = vadd.s32 %v64_v13, %v58_v11  ;;  %v67_v16 = vadd.s32 %v65_v14, %v59_v12  ;;  %v72_v17 = vsel %vm70_vm6, 1, %v639_v4  ;;  %v73_v18 = vsel %vm71_vm7, 1, %v639_v4  ;;  %s734_s6 = sld [smem:[#allocation2 + $0x200]] }
  0x1b   :  { %v701_v19 = vstv %s477_s25  ;;  %v703_v20 = vstv %s478_s26  ;;  %v705_v21 = vstv %s479_s27  ;;  %v707_v22 = vstv %s480_s28  ;;  %s736_s7 = sld [smem:[#allocation2 + $0x280]] }
  0x1c   :  { %v74_v23 = vadd.s32 %v72_v17, %v66_v15  ;;  %v75_v24 = vadd.s32 %v73_v18, %v67_v16  ;;  %vm78_vm8 = vcmp.lt.f32.partialorder %v701_v19, %v671_v0  ;;  %vm79_vm9 = vcmp.lt.f32.partialorder %v701_v19, %v673_v1  ;;  %s738_s8 = sld [smem:[#allocation2 + $0x300]] }
  0x1d   :  { %v80_v25 = vsel %vm78_vm8, 1, %v639_v4  ;;  %v81_v26 = vsel %vm79_vm9, 1, %v639_v4  ;;  %vm86_vm10 = vcmp.lt.f32.partialorder %v703_v20, %v671_v0  ;;  %vm87_vm11 = vcmp.lt.f32.partialorder %v703_v20, %v673_v1  ;;  %s740_s9 = sld [smem:[#allocation2 + $0x81]] }
  0x1e   :  { %v82_v27 = vadd.s32 %v80_v25, %v74_v23  ;;  %v83_v28 = vadd.s32 %v81_v26, %v75_v24  ;;  %v88_v29 = vsel %vm86_vm10, 1, %v639_v4  ;;  %v89_v30 = vsel %vm87_vm11, 1, %v639_v4  ;;  %s742_s10 = sld [smem:[#allocation2 + $0x101]] }
  0x1f   :  { %vm94_vm12 = vcmp.lt.f32.partialorder %v705_v21, %v671_v0  ;;  %vm95_vm13 = vcmp.lt.f32.partialorder %v705_v21, %v673_v1  ;;  %vm102_vm14 = vcmp.lt.f32.partialorder %v707_v22, %v671_v0  ;;  %vm103_vm15 = vcmp.lt.f32.partialorder %v707_v22, %v673_v1  ;;  %s744_s11 = sld [smem:[#allocation2 + $0x181]] }
  0x20   :  { %v90_v31 = vadd.s32 %v88_v29, %v82_v27  ;;  %v91_v32 = vadd.s32 %v89_v30, %v83_v28  ;;  %v96_v33 = vsel %vm94_vm12, 1, %v639_v4  ;;  %v97_v34 = vsel %vm95_vm13, 1, %v639_v4  ;;  %s746_s12 = sld [smem:[#allocation2 + $0x201]] }
  0x21   :  { %v104_v35 = vsel %vm102_vm14, 1, %v639_v4  ;;  %v105_v36 = vsel %vm103_vm15, 1, %v639_v4  ;;  %v109_v37 = vstv %s699_s29  ;;  %s748_s13 = sld [smem:[#allocation2 + $0x281]]  ;;  %v131_v52 = vstv %s725_s30 }
  0x22   :  { %v98_v38 = vadd.s32 %v96_v33, %v90_v31  ;;  %v99_v39 = vadd.s32 %v97_v34, %v91_v32  ;;  %vm110_vm0 = vcmp.lt.f32.partialorder %v109_v37, %v671_v0  ;;  %vm111_vm1 = vcmp.lt.f32.partialorder %v109_v37, %v673_v1  ;;  %s750_s14 = sld [smem:[#allocation2 + $0x301]] }
  0x23   :  { %v112_v40 = vsel %vm110_vm0, 1, %v639_v4  ;;  %v113_v41 = vsel %vm111_vm1, 1, %v639_v4  ;;  %s752_s15 = sld [smem:[#allocation2 + $0x82]]  ;;  %v135_v53 = vstv %s727_s4  ;;  %v139_v54 = vstv %s730_s5 }
  0x24   :  { %v106_v42 = vadd.s32 %v104_v35, %v98_v38  ;;  %v107_v43 = vadd.s32 %v105_v36, %v99_v39  ;;  %s754_s16 = sld [smem:[#allocation2 + $0x102]]  ;;  %v143_v55 = vstv %s734_s6  ;;  %v147_v56 = vstv %s736_s7 }
  0x25   :  { %s756_s17 = sld [smem:[#allocation2 + $0x182]]  ;;  %v151_v57 = vstv %s738_s8  ;;  %v159_v58 = vstv %s740_s9  ;;  %v163_v59 = vstv %s742_s10  ;;  %v167_v60 = vstv %s744_s11 }
  0x26   :  { %v114_v44 = vadd.s32 %v112_v40, %v106_v42  ;;  %v115_v45 = vadd.s32 %v113_v41, %v107_v43  ;;  %s758_s18 = sld [smem:[#allocation2 + $0x202]]  ;;  %v171_v61 = vstv %s746_s12 }
  0x27   :  { %s760_s19 = sld [smem:[#allocation2 + $0x282]]  ;;  %v175_v62 = vstv %s748_s13 }
  0x28   :  { %vm116_vm2 = vcmp.gt.s32.totalorder %v114_v44, 1  ;;  %vm118_vm3 = vcmp.gt.s32.totalorder %v115_v45, 1  ;;  %v179_v63 = vstv %s750_s14  ;;  %s793_s20 = sld [smem:[#allocation2 + $0x302]] }
  0x29   :  { %v117_v46 = vsel %vm116_vm2, %v114_v44, 1  ;;  %v119_v47 = vsel %vm118_vm3, %v115_v45, 1  ;;  %v187_v4 = vstv %s752_s15  ;;  %s803_s0 = sld [smem:[#allocation2 + $0x83]] }
  0x2a   :  { %vm120_vm4 = vcmp.lt.s32.totalorder %v117_v46, 8  ;;  %vm122_vm5 = vcmp.lt.s32.totalorder %v119_v47, 8  ;;  %v191_v5 = vstv %s754_s16  ;;  %s813_s23 = sld [smem:[#allocation2 + $0x103]] }
  0x2b   :  { %v121_v48 = vsel %vm120_vm4, %v117_v46, 8  ;;  %v123_v49 = vsel %vm122_vm5, %v119_v47, 8  ;;  %v195_v6 = vstv %s756_s17  ;;  %s823_s1 = sld [smem:[#allocation2 + $0x183]] }
  0x2c   :  { %v762_v50 = vadd.s32 4294967295, %v121_v48  ;;  %v764_v51 = vadd.s32 4294967295, %v123_v49  ;;  %v199_v7 = vstv %s758_s18  ;;  %s835_s24 = sld [smem:[#allocation2 + $0x203]] }
  0x2d   :  { %v203_v8 = vstv %s760_s19  ;;  %s843_s25 = sld [smem:[#allocation2 + $0x283]] }
  0x2e   :  { %vm126_vm6 = vcmp.eq.s32.totalorder %v762_v50, 0  ;;  %vm127_vm7 = vcmp.eq.s32.totalorder %v764_v51, 0  ;;  %vm154_vm8 = vcmp.eq.s32.totalorder %v762_v50, 1  ;;  %vm155_vm9 = vcmp.eq.s32.totalorder %v764_v51, 1  ;;  %s853_s26 = sld [smem:[#allocation2 + $0x303]] }
  0x2f   :  { %v128_v11 = vsel %vm126_vm6, %v675_v2, 0.0  ;;  %v129_v12 = vsel %vm127_vm7, %v675_v2, 0.0  ;;  %v132_v13 = vsel %vm126_vm6, %v131_v52, 0.0  ;;  %v133_v14 = vsel %vm127_vm7, %v131_v52, 0.0  ;;  %s863_s27 = sld [smem:[#allocation2 + $0x104]] }
  0x30   :  { %v136_v15 = vsel %vm126_vm6, %v135_v53, 0.0  ;;  %v137_v16 = vsel %vm127_vm7, %v135_v53, 0.0  ;;  %v140_v2 = vsel %vm126_vm6, %v139_v54, 0.0  ;;  %v141_v17 = vsel %vm127_vm7, %v139_v54, 0.0  ;;  %s873_s28 = sld [smem:[#allocation2 + $0x184]] }
  0x31   :  { %v144_v18 = vsel %vm126_vm6, %v143_v55, 0.0  ;;  %v145_v23 = vsel %vm127_vm7, %v143_v55, 0.0  ;;  %v148_v24 = vsel %vm126_vm6, %v147_v56, 0.0  ;;  %v149_v25 = vsel %vm127_vm7, %v147_v56, 0.0  ;;  %s885_s29 = sld [smem:[#allocation2 + $0x204]] }
  0x32   :  { %v152_v26 = vsel %vm126_vm6, %v151_v57, 0.0  ;;  %v153_v27 = vsel %vm127_vm7, %v151_v57, 0.0  ;;  %v156_v28 = vsel %vm154_vm8, %v681_v3, %v128_v11  ;;  %v157_v29 = vsel %vm155_vm9, %v681_v3, %v129_v12  ;;  %s894_s30 = sld [smem:[#allocation2 + $0x284]] }
  0x33   :  { %v160_v30 = vsel %vm154_vm8, %v159_v58, %v132_v13  ;;  %v161_v31 = vsel %vm155_vm9, %v159_v58, %v133_v14  ;;  %v164_v32 = vsel %vm154_vm8, %v163_v59, %v136_v15  ;;  %v165_v33 = vsel %vm155_vm9, %v163_v59, %v137_v16  ;;  %s902_s4 = sld [smem:[#allocation2 + $0x185]] }
  0x34   :  { %vm182_vm10 = vcmp.eq.s32.totalorder %v762_v50, 2  ;;  %vm183_vm11 = vcmp.eq.s32.totalorder %v764_v51, 2  ;;  %v168_v3 = vsel %vm154_vm8, %v167_v60, %v140_v2  ;;  %v169_v34 = vsel %vm155_vm9, %v167_v60, %v141_v17  ;;  %s911_s5 = sld [smem:[#allocation2 + $0x304]] }
  0x35   :  { %v172_v35 = vsel %vm154_vm8, %v171_v61, %v144_v18  ;;  %v173_v36 = vsel %vm155_vm9, %v171_v61, %v145_v23  ;;  %v176_v37 = vsel %vm154_vm8, %v175_v62, %v148_v24  ;;  %v177_v38 = vsel %vm155_vm9, %v175_v62, %v149_v25  ;;  %s921_s6 = sld [smem:[#allocation2 + $0x205]] }
  0x36   :  { %v180_v39 = vsel %vm154_vm8, %v179_v63, %v152_v26  ;;  %v181_v40 = vsel %vm155_vm9, %v179_v63, %v153_v27  ;;  %v184_v41 = vsel %vm182_vm10, %v687_v9, %v156_v28  ;;  %v185_v42 = vsel %vm183_vm11, %v687_v9, %v157_v29  ;;  %s935_s7 = sld [smem:[#allocation2 + $0x186]] }
  0x37   :  { %v207_v43 = vstv %s793_s20  ;;  %vm210_vm12 = vcmp.eq.s32.totalorder %v762_v50, 3  ;;  %v188_v44 = vsel %vm182_vm10, %v187_v4, %v160_v30  ;;  %v879_v45 = vsel %vm183_vm11, %v187_v4, %v161_v31  ;;  %s946_s8 = sld [smem:[#allocation2 + $0x285]] }
  0x38   :  { %v192_v46 = vsel %vm182_vm10, %v191_v5, %v164_v32  ;;  %v193_v9 = vsel %vm183_vm11, %v191_v5, %v165_v33  ;;  %v196_v47 = vsel %vm182_vm10, %v195_v6, %v168_v3  ;;  %v197_v48 = vsel %vm183_vm11, %v195_v6, %v169_v34  ;;  %s955_s9 = sld [smem:[#allocation2 + $0x206]] }
  0x39   :  { %v200_v49 = vsel %vm182_vm10, %v199_v7, %v172_v35  ;;  %vm211_vm13 = vcmp.eq.s32.totalorder %v764_v51, 3  ;;  %v201_v52 = vsel %vm183_vm11, %v199_v7, %v173_v36  ;;  %v204_v53 = vsel %vm182_vm10, %v203_v8, %v176_v37  ;;  %s965_s10 = sld [smem:[#allocation2 + $0x187]] }
  0x3a   :  { %v215_v54 = vstv %s803_s0  ;;  %v219_v55 = vstv %s813_s23  ;;  %v205_v56 = vsel %vm183_vm11, %v203_v8, %v177_v38  ;;  %v208_v57 = vsel %vm182_vm10, %v207_v43, %v180_v39  ;;  %s974_s11 = sld [smem:[#allocation2 + $0x305]] }
  0x3b   :  { %v209_v58 = vsel %vm183_vm11, %v207_v43, %v181_v40  ;;  %v223_v59 = vstv %s823_s1  ;;  %v212_v60 = vsel %vm210_vm12, %v689_v10, %v184_v41  ;;  %v213_v61 = vsel %vm211_vm13, %v689_v10, %v185_v42  ;;  %s982_s12 = sld [smem:[#allocation2 + $0x286]] }
  0x3c   :  { %v227_v62 = vstv %s835_s24  ;;  %v231_v63 = vstv %s843_s25  ;;  %v927_v4 = vsel %vm210_vm12, %v215_v54, %v188_v44  ;;  %v931_v5 = vsel %vm210_vm12, %v219_v55, %v192_v46  ;;  %s992_s13 = sld [smem:[#allocation2 + $0x207]]  ;;  %s640_s24 = smov [#allocation7]  }
  0x3d   :  { %vm238_vm14 = vcmp.eq.s32.totalorder %v762_v50, 4  ;;  %vm239_vm15 = vcmp.eq.s32.totalorder %v764_v51, 4  ;;  %v939_v10 = vsel %vm211_vm13, %v219_v55, %v193_v9  ;;  %v224_v6 = vsel %vm210_vm12, %v223_v59, %v196_v47  ;;  %s1006_s14 = sld [smem:[#allocation2 + $0x306]]  ;;  %s440_s25 = sshll.u32 %s640_s24, 4  ;;  %s441_s25 = int_to_ptr.vmem [resolvable:$true] %s440_s25 }
  0x3e   :  { %v225_v7 = vsel %vm211_vm13, %v223_v59, %v197_v48  ;;  %v235_v8 = vstv %s853_s26  ;;  %v228_v11 = vsel %vm210_vm12, %v227_v62, %v200_v49  ;;  %v229_v12 = vsel %vm211_vm13, %v227_v62, %v201_v52  ;;  %s1017_s15 = sld [smem:[#allocation2 + $0x287]] }
  0x3f   :  { %v232_v13 = vsel %vm210_vm12, %v231_v63, %v204_v53  ;;  %v251_v14 = vstv %s873_s28  ;;  %v240_v15 = vsel %vm238_vm14, %v701_v19, %v212_v60  ;;  %v241_v16 = vsel %vm239_vm15, %v701_v19, %v213_v61  ;;  %s1019_s16 = sld [smem:[#allocation2 + $0x84]]  ;;  %s442_s28 = sshll.u32 %s1191_s2, 4  ;;  %s443_s28 = int_to_ptr.hbm [resolvable:$true] %s442_s28 }
  0x40   :  { %vm266_vm0 = vcmp.eq.s32.totalorder %v762_v50, 5  ;;  %vm267_vm1 = vcmp.eq.s32.totalorder %v764_v51, 5  ;;  %v233_v2 = vsel %vm211_vm13, %v231_v63, %v205_v56  ;;  %v236_v17 = vsel %vm210_vm12, %v235_v8, %v208_v57  ;;  %s1043_s17 = sld [smem:[#allocation2 + $0x307]] }
  0x41   :  { %v237_v18 = vsel %vm211_vm13, %v235_v8, %v209_v58  ;;  %v255_v23 = vstv %s885_s29  ;;  %v252_v19 = vsel %vm238_vm14, %v251_v14, %v224_v6  ;;  %v253_v24 = vsel %vm239_vm15, %v251_v14, %v225_v7  ;;  %s1045_s18 = sld [smem:[#allocation2 + $0x105]]  ;;  %s641_s29 = smov [#allocation8]  }
  0x42   :  { %v259_v25 = vstv %s894_s30  ;;  %v279_v26 = vstv %s902_s4  ;;  %v268_v27 = vsel %vm266_vm0, %v703_v20, %v240_v15  ;;  %v269_v28 = vsel %vm267_vm1, %v703_v20, %v241_v16  ;;  %s1062_s19 = sld [smem:[#allocation2 + $0x85]]  ;;  %s453_s30 = sshll.u32 %s641_s29, 4  ;;  %s454_s30 = int_to_ptr.vmem [resolvable:$true] %s453_s30 }
  0x43   :  { %vm294_vm2 = vcmp.eq.s32.totalorder %v762_v50, 6  ;;  %vm295_vm3 = vcmp.eq.s32.totalorder %v764_v51, 6  ;;  %v247_v29 = vstv %s863_s27  ;;  %v256_v30 = vsel %vm238_vm14, %v255_v23, %v228_v11  ;;  %s1070_s20 = sld [smem:[#allocation2 + $0x106]] }
  0x44   :  { %v263_v31 = vstv %s911_s5  ;;  %v283_v32 = vstv %s921_s6  ;;  %v257_v33 = vsel %vm239_vm15, %v255_v23, %v229_v12  ;;  %v280_v3 = vsel %vm266_vm0, %v279_v26, %v252_v19  ;;  %s1096_s23 = sld [smem:[#allocation2 + $0x86]]  ;;  %s455_s6 = sshll.u32 %s1192_s3, 4  ;;  %s456_s6 = int_to_ptr.hbm [resolvable:$true] %s455_s6 }
  0x45   :  { %v281_v20 = vsel %vm267_vm1, %v279_v26, %v253_v24  ;;  %v307_v34 = vstv %s935_s7  ;;  %v260_v35 = vsel %vm238_vm14, %v259_v25, %v232_v13  ;;  %v296_v36 = vsel %vm294_vm2, %v705_v21, %v268_v27  ;;  %s1102_s1 = sld [smem:[#allocation2 + $0x107]] }
  0x46   :  { %v297_v37 = vsel %vm295_vm3, %v705_v21, %v269_v28  ;;  %vm322_vm4 = vcmp.eq.s32.totalorder %v762_v50, 7  ;;  %v261_v38 = vsel %vm239_vm15, %v259_v25, %v233_v2  ;;  %v284_v39 = vsel %vm266_vm0, %v283_v32, %v256_v30  ;;  %s1133_s0 = sld [smem:[#allocation2 + $0x87]] }
  0x47   :  { %v287_v40 = vstv %s946_s8  ;;  %vm323_vm5 = vcmp.eq.s32.totalorder %v764_v51, 7  ;;  %v308_v21 = vsel %vm294_vm2, %v307_v34, %v280_v3  ;;  %v309_v41 = vsel %vm295_vm3, %v307_v34, %v281_v20 }
  0x48   :  { %v311_v42 = vstv %s955_s9  ;;  %v335_v43 = vstv %s965_s10  ;;  %v264_v44 = vsel %vm238_vm14, %v263_v31, %v236_v17  ;;  %v285_v46 = vsel %vm267_vm1, %v283_v32, %v257_v33 }
  0x49   :  { %v324_v9 = vsel %vm322_vm4, %v707_v22, %v296_v36  ;;  %v325_v47 = vsel %vm323_vm5, %v707_v22, %v297_v37  ;;  %v288_v48 = vsel %vm266_vm0, %v287_v40, %v260_v35  ;;  %v289_v49 = vsel %vm267_vm1, %v287_v40, %v261_v38 }
  0x4a   :  { %v291_v52 = vstv %s974_s11  ;;  %v315_v53 = vstv %s982_s12  ;;  %v312_v55 = vsel %vm294_vm2, %v311_v42, %v284_v39  ;;  %v336_v22 = vsel %vm322_vm4, %v335_v43, %v308_v21 }
  0x4b   :  { %v337_v56 = vsel %vm323_vm5, %v335_v43, %v309_v41  ;;  %v339_v57 = vstv %s992_s13  ;;  %v265_v58 = vsel %vm239_vm15, %v263_v31, %v237_v18  ;;  %v313_v59 = vsel %vm295_vm3, %v311_v42, %v285_v46 }
  0x4c   :  { %v350_v60 = vsub.f32 %v671_v0, %v324_v9  ;;  %v351_v61 = vsub.f32 %v673_v1, %v325_v47  ;;  %v292_v62 = vsel %vm266_vm0, %v291_v52, %v264_v44  ;;  %v316_v63 = vsel %vm294_vm2, %v315_v53, %v288_v48 }
  0x4d   :  { %v317_v6 = vsel %vm295_vm3, %v315_v53, %v289_v49  ;;  %v319_v7 = vstv %s1006_s14  ;;  %v1079_v8 = vsel %vm322_vm4, %v339_v57, %v312_v55  ;;  %v343_v11 = vstv %s1017_s15 }
  0x4e   :  { %v352_v0 = vmul.f32 %v350_v60, %v336_v22  ;;  %v353_v1 = vmul.f32 %v351_v61, %v337_v56  ;;  %v243_v12 = vstv %s1019_s16  ;;  %v293_v13 = vsel %vm267_vm1, %v291_v52, %v265_v58 }
  0x4f   :  { %v1087_v14 = vsel %vm323_vm5, %v339_v57, %v313_v59  ;;  %v360_v15 = vadd.f32 %v1079_v8, %v1079_v8  ;;  %v248_v16 = vsel %vm238_vm14, %v247_v29, %v931_v5  ;;  %v320_v23 = vsel %vm294_vm2, %v319_v7, %v292_v62 }
  0x50   :  { %v354_v2 = vsub.f32 1.0, %v352_v0  ;;  %v355_v17 = vsub.f32 1.0, %v353_v1  ;;  %v361_v18 = vadd.f32 %v1087_v14, %v1087_v14  ;;  %v344_v19 = vsel %vm322_vm4, %v343_v11, %v316_v63 }
  0x51   :  { %v345_v5 = vsel %vm323_vm5, %v343_v11, %v317_v6  ;;  %v347_v24 = vstv %s1043_s17  ;;  %v275_v25 = vstv %s1045_s18  ;;  %v321_v26 = vsel %vm295_vm3, %v319_v7, %v293_v13 }
  0x52   :  { %v356_v27 = vmul.f32 %v354_v2, %v352_v0  ;;  %v357_v28 = vmul.f32 %v355_v17, %v353_v1  ;;  %v217_v30 = vsel %vm211_vm13, %v215_v54, %v879_v45  ;;  %v244_v31 = vsel %vm238_vm14, %v243_v12, %v927_v4 }
  0x53   :  { %v249_v32 = vsel %vm239_vm15, %v247_v29, %v939_v10  ;;  %v362_v33 = vadd.f32 %v360_v15, %v344_v19  ;;  %v348_v3 = vsel %vm322_vm4, %v347_v24, %v320_v23  ;;  %v363_v20 = vadd.f32 %v361_v18, %v345_v5 }
  0x54   :  { %v366_v34 = vmul.f32 %v356_v27, %v344_v19  ;;  %v367_v35 = vmul.f32 %v357_v28, %v345_v5  ;;  %v271_v36 = vstv %s1062_s19  ;;  %v276_v45 = vsel %vm266_vm0, %v275_v25, %v248_v16 }
  0x55   :  { %v303_v54 = vstv %s1070_s20  ;;  %v349_v4 = vsel %vm323_vm5, %v347_v24, %v321_v26  ;;  %v358_v10 = vmul.f32 %v352_v0, %v352_v0  ;;  %v359_v29 = vmul.f32 %v353_v1, %v353_v1 }
  0x56   :  { %v368_v37 = vadd.f32 %v366_v34, %v1079_v8  ;;  %v369_v38 = vadd.f32 %v367_v35, %v1087_v14  ;;  %v245_v39 = vsel %vm239_vm15, %v243_v12, %v217_v30  ;;  %v364_v40 = vsub.f32 %v362_v33, %v348_v3 }
  0x57   :  { %v272_v21 = vsel %vm266_vm0, %v271_v36, %v244_v31  ;;  %v277_v41 = vsel %vm267_vm1, %v275_v25, %v249_v32  ;;  %v365_v42 = vsub.f32 %v363_v20, %v349_v4  ;;  %v299_v43 = vstv %s1096_s23 }
  0x58   :  { %539 = vrcp.f32 %v368_v37  ;;  %v304_v44 = vsel %vm294_vm2, %v303_v54, %v276_v45  ;;  %v331_v46 = vstv %s1102_s1  ;;  %v400_v9 = vmul.f32 %v358_v10, %v1079_v8 }
  0x59   :  { %541 = vrcp.f32 %v369_v38  ;;  %v401_v47 = vmul.f32 %v359_v29, %v1087_v14  ;;  %v412_v48 = vmul.f32 %v354_v2, %v354_v2  ;;  %v413_v49 = vmul.f32 %v355_v17, %v355_v17 }
  0x5a   :  { %v402_v52 = vmul.f32 %v356_v27, %v348_v3  ;;  %v403_v53 = vmul.f32 %v357_v28, %v349_v4  ;;  %v406_v55 = vmul.f32 %v364_v40, %v358_v10  ;;  %v408_v22 = vmul.f32 %v360_v15, %v356_v27 }
  0x5b   :  { %v407_v56 = vmul.f32 %v365_v42, %v359_v29  ;;  %v409_v57 = vmul.f32 %v361_v18, %v357_v28  ;;  %v273_v58 = vsel %vm267_vm1, %v271_v36, %v245_v39  ;;  %v300_v59 = vsel %vm294_vm2, %v299_v43, %v272_v21 }
  0x5c   :  { %v305_v60 = vsel %vm295_vm3, %v303_v54, %v277_v41  ;;  %v327_v62 = vstv %s1133_s0  ;;  %v332_v63 = vsel %vm322_vm4, %v331_v46, %v304_v44  ;;  %v414_v6 = vmul.f32 %v412_v48, %v348_v3 }
  0x5d   :  { %v415_v7 = vmul.f32 %v413_v49, %v349_v4  ;;  %v404_v1 = vadd.f32 %v402_v52, %v400_v9  ;;  %v405_v12 = vadd.f32 %v403_v53, %v401_v47  ;;  %v410_v13 = vadd.f32 %v408_v22, %v406_v55 }
  0x5e   :  { %v540_v61 = vpop.eup %539  ;;  %vm375_vm6 = vweird.f32 %v368_v37  ;;  %v381_v15 = vand.u32 2147483648, %v368_v37  ;;  %v411_v2 = vadd.f32 %v409_v57, %v407_v56  ;;  %v379_v18 = vand.u32 2147483647, %v368_v37 }
  0x5f   :  { %v542_v11 = vpop.eup %541  ;;  %v371_v0 = vmul.f32 %v540_v61, %v368_v37  ;;  %vm376_vm7 = vweird.f32 %v540_v61  ;;  %v396_v23 = vand.u32 2147483648, %v369_v38  ;;  %vm390_vm8 = vweird.f32 %v369_v38 }
  0x60   :  { %v386_v16 = vmul.f32 %v542_v11, %v369_v38  ;;  %vm391_vm9 = vweird.f32 %v542_v11  ;;  %v394_v5 = vand.u32 2147483647, %v369_v38  ;;  %v333_v24 = vsel %vm323_vm5, %v331_v46, %v305_v60  ;;  %vm1163_vm10 = vmor %vm375_vm6, %vm376_vm7 }
  0x61   :  { %v372_v17 = vsub.f32 1.0, %v371_v0  ;;  %v416_v26 = vadd.f32 %v414_v6, %v410_v13  ;;  %v426_v27 = vmul.f32 %v1079_v8, %v1079_v8  ;;  %v382_v30 = vor.u32 1.1754944e-38, %v381_v15  ;;  %vm392_vm12 = vmor %vm390_vm8, %vm391_vm9 }
  0x62   :  { %v387_v19 = vsub.f32 1.0, %v386_v16  ;;  %v417_v32 = vadd.f32 %v415_v7, %v411_v2  ;;  %v427_v33 = vmul.f32 %v1087_v14, %v1087_v14  ;;  %vm380_vm11 = vcmp.eq.f32.partialorder %v379_v18, 8.507059e+37 }
  0x63   :  { %v373_v25 = vmul.f32 %v540_v61, %v372_v17  ;;  %v397_v20 = vor.u32 1.1754944e-38, %v396_v23  ;;  %v418_v34 = vmul.f32 %v404_v1, %v332_v63  ;;  %v301_v35 = vsel %vm295_vm3, %v299_v43, %v273_v58 }
  0x64   :  { %v388_v31 = vmul.f32 %v542_v11, %v387_v19  ;;  %vm395_vm13 = vcmp.eq.f32.partialorder %v394_v5, 8.507059e+37  ;;  %v419_v36 = vmul.f32 %v405_v12, %v333_v24  ;;  %v428_v54 = vmul.f32 %v426_v27, %v416_v26 }
  0x65   :  { %v374_v3 = vadd.f32 %v540_v61, %v373_v25  ;;  %v328_v4 = vsel %vm322_vm4, %v327_v62, %v300_v59  ;;  %v429_v29 = vmul.f32 %v427_v33, %v417_v32  ;;  %v329_v37 = vsel %vm323_vm5, %v327_v62, %v301_v35 }
  0x66   :  { %v389_v8 = vadd.f32 %v542_v11, %v388_v31 }
  0x67   :  { %v378_v45 = vsel %vm1163_vm10, %v540_v61, %v374_v3 }
  0x68   :  { %v383_v10 = vsel %vm380_vm11, %v382_v30, %v378_v45  ;;  %v393_v14 = vsel %vm392_vm12, %v542_v11, %v389_v8 }
  0x69   :  { %v398_v38 = vsel %vm395_vm13, %v397_v20, %v393_v14  ;;  %v420_v39 = vmul.f32 %v418_v34, %v383_v10  ;;  %v430_v40 = vmul.f32 %v383_v10, %v383_v10 }
  0x6a   :  { %v421_v21 = vmul.f32 %v419_v36, %v398_v38  ;;  %v431_v41 = vmul.f32 %v398_v38, %v398_v38 }
  0x6b   :  { %v422_v42 = vadd.f32 %v420_v39, %v328_v4  ;;  %v432_v50 = vmul.f32 %v430_v40, %v428_v54 }
  0x6c   :  { %v423_v51 = vadd.f32 %v421_v21, %v329_v37  ;;  %v433_v43 = vmul.f32 %v431_v41, %v429_v29 }
  0x6d   :  { %424 = vst [vmem:[#allocation7] sm:$0xff] %v422_v42 }
  0x6e   :  { %425 = vst [vmem:[#allocation7 + $0x8] sm:$0xff] %v423_v51 }
  0x6f   :  { %434 = vst [vmem:[#allocation8] sm:$0xff] %v432_v50  ;;  %448 = dma.vmem_to_hbm [thread:$0]  %s441_s25, 256, %s443_s28, [#allocation4], %s637_s21, %s637_s21, %s638_s22  }
  0x70   :  { %435 = vst [vmem:[#allocation8 + $0x8] sm:$0xff] %v433_v43 }
  0x71   :  { %461 = dma.vmem_to_hbm [thread:$0]  %s454_s30, 256, %s456_s6, [#allocation9], %s637_s21, %s637_s21, %s638_s22  }
  0x72   :  { %631 = dma.done.wait [#allocation4], 256  }
  0x73   :  { %632 = vsyncadd [#allocation4], 4294967040 }
  0x74   :  { %633 = dma.done.wait [#allocation9], 256  }
  0x75   :  { %634 = vsyncadd [#allocation9], 4294967040 }
  0x76   :  { %470 = vsyncpa [#allocation3], 1 }
  0x77   :  { %471 = vsyncpa [#allocation4], 1 }
  0x78   :  { %472 = vsyncpa [#allocation9], 1 }
  0x79   :  { %473 = vsyncpa [#allocation5], 1 }

</bundles_post_ra>
